<compile_context>
chip_gen: v6e
topology: v6e:2x2x1
jax: 0.10.0
libtpu: 0.0.40
codegen_flags: <defaults>
</compile_context>

<pallas_src>
import jax
import jax.numpy as jnp
from jax import lax
from jax.experimental import pallas as pl
from jax.experimental.pallas import tpu as pltpu


def basic_block_kernel(x_main_ref, x_top_ref, x_bot_ref,
                       w1_ref, b1_ref, w2_ref, b2_ref, out_ref):
    # x_main_ref: (1, tH, W, Cin) bf16   x_top_ref / x_bot_ref: (1, 1, W, Cin) bf16
    # w1_ref: (Cin, Cmid) bf16 (bn1 scale folded)     b1_ref: (1, Cmid) f32
    # w2_ref: (3, 3*Cmid, Cout) bf16 (bn2 scale folded)  b2_ref: (1, Cout) f32
    # out_ref: (1, tH, W, Cout) f32
    _, tH, W, Cin = x_main_ref.shape
    Cmid = w1_ref.shape[1]
    Cout = w2_ref.shape[2]
    tHe = tH + 2
    tHW = tH * W

    i = pl.program_id(1)
    last = pl.num_programs(1) - 1

    w1 = w1_ref[...]
    b1 = b1_ref[...]

    # ---- conv1 (1x1, bn1 scale folded) + bias + LeakyReLU(0.1): main rows ----
    x_main = x_main_ref[0]                                      # (tH, W, Cin) bf16
    h_main = jnp.dot(x_main.reshape(tHW, Cin), w1,
                     preferred_element_type=jnp.float32)        # (tHW, Cmid) f32
    h_main = h_main + b1
    h_main = jnp.maximum(h_main, 0.1 * h_main)
    h_main = h_main.reshape(tH, W, Cmid)

    # ---- conv1 recomputed on the 2 halo rows (one tiny matmul) ----
    x_halo = jnp.concatenate([x_top_ref[0, 0], x_bot_ref[0, 0]], axis=0)  # (2W, Cin)
    h_halo = jnp.dot(x_halo, w1, preferred_element_type=jnp.float32)      # (2W, Cmid)
    h_halo = h_halo + b1
    h_halo = jnp.maximum(h_halo, 0.1 * h_halo)
    # Halo rows at the true image border are clamped duplicates; conv2 zero-pads
    # h there, so zero them out (scalar keep-mask multiply, no iota mask).
    keep_top = (i > 0).astype(jnp.float32)
    keep_bot = (i < last).astype(jnp.float32)
    h_top = (h_halo[0:W] * keep_top).reshape(1, W, Cmid)
    h_bot = (h_halo[W:2 * W] * keep_bot).reshape(1, W, Cmid)

    h_ext = jnp.concatenate([h_top, h_main, h_bot], axis=0)     # (tHe, W, Cmid) f32

    # ---- dx-shifted channel concat ONCE (channel blocks dx=0,1,2 -> x-1,x,x+1),
    #      single reshape + single bf16 cast of the full slab ----
    zcol = jnp.zeros((tHe, 1, Cmid), jnp.float32)
    hpad = jnp.concatenate([zcol, h_ext, zcol], axis=1)         # (tHe, W+2, Cmid)
    hcat = jnp.concatenate([hpad[:, 0:W], hpad[:, 1:W + 1], hpad[:, 2:W + 2]],
                           axis=2)                              # (tHe, W, 3*Cmid)
    hcat2 = hcat.reshape(tHe * W, 3 * Cmid).astype(jnp.bfloat16)

    # ---- conv2 (3x3, bn2 scale folded): 3 fat matmuls (K = 3*Cmid) over dy,
    #      accumulated in a LOCAL f32 value (no VMEM scratch round-trips) ----
    acc = jnp.dot(hcat2[0:tHW], w2_ref[0],
                  preferred_element_type=jnp.float32)           # (tHW, Cout)
    acc = acc + jnp.dot(hcat2[W:W + tHW], w2_ref[1],
                        preferred_element_type=jnp.float32)
    acc = acc + jnp.dot(hcat2[2 * W:2 * W + tHW], w2_ref[2],
                        preferred_element_type=jnp.float32)

    # ---- bias + LeakyReLU(0.1) + residual (residual add done in f32) ----
    y = acc + b2_ref[...]
    y = jnp.maximum(y, 0.1 * y)
    y = y.reshape(tH, W, Cout) + x_main.astype(jnp.float32)
    out_ref[0] = y.astype(out_ref.dtype)


def _vmem_bytes_estimate(tH, W, Cin, Cmid, Cout):
    """Rough per-step VMEM footprint (double-buffered I/O + live intermediates)."""
    tHe = tH + 2
    bf16, f32 = 2, 4
    est = 0
    est += 2 * tH * W * Cin * bf16                      # main x tile (x2 buffers)
    est += 2 * 2 * W * Cin * bf16                       # two 1-row halos (x2 buffers)
    est += 2 * tH * W * Cout * f32                      # output tile (x2 buffers)
    est += 2 * (Cin * Cmid * bf16 + 9 * Cmid * Cout * bf16
                + (Cmid + Cout) * f32)                  # weights / biases (x2 buffers)
    est += tHe * W * Cmid * f32                         # h_ext
    est += tHe * W * 3 * Cmid * (f32 + bf16)            # hcat (f32) + hcat2 (bf16)
    est += 2 * tH * W * Cout * f32                      # conv2 accumulator + temps
    return est


def _choose_tile_h(H, W, Cin, Cmid, Cout, budget):
    best = 1
    for cand in range(1, H + 1):
        if H % cand:
            continue
        if _vmem_bytes_estimate(cand, W, Cin, Cmid, Cout) <= budget:
            best = cand
    # Keep >= 2 grid steps along H when possible so both v7x TensorCores get
    # work even at batch 1 (no-op on 1-TC v5e/v6e beyond slightly smaller tiles).
    if best == H and H > 1:
        proper = [d for d in range(1, H) if H % d == 0]
        if proper:
            best = max(proper)
    return best


def basic_block_pallas(x_nchw, w1_oihw, w2_oihw,
                       g1, be1, m1, v1, g2, be2, m2, v2,
                       eps=1e-5, tile_h=None):
    """x_nchw: (N, Cin, H, W) float32. Returns (N, Cout, H, W) float32."""
    N, Cin, H, W = x_nchw.shape
    Cmid = w1_oihw.shape[0]
    Cout = w2_oihw.shape[0]
    assert Cout == Cin, "residual add requires planes[1] == inplanes"
    assert w1_oihw.shape[2:] == (1, 1) and w2_oihw.shape[2:] == (3, 3)

    # Generation-aware VMEM limit (v7x: 64 MiB physical; v5e/v6e: 128 MiB).
    try:
        vmem_cap = int(pltpu.get_tpu_info().vmem_capacity_bytes)
    except Exception:
        vmem_cap = 64 * 1024 * 1024
    vmem_limit = max(16 * 1024 * 1024, min(vmem_cap // 2, 64 * 1024 * 1024))

    if tile_h is None:
        tile_h = _choose_tile_h(H, W, Cin, Cmid, Cout, budget=(vmem_limit * 3) // 4)
    assert H % tile_h == 0
    tH = tile_h
    n_ht = H // tH

    # ---- glue: layout conversion + eval-mode BN folding into weights ----
    x = jnp.transpose(x_nchw, (0, 2, 3, 1)).astype(jnp.bfloat16)   # NHWC, bf16

    def fold(g, b, m, v):
        s = g / jnp.sqrt(v + eps)
        return s, b - m * s

    s1, b1 = fold(g1, be1, m1, v1)
    s2, b2 = fold(g2, be2, m2, v2)

    # conv1: OIHW (Cmid,Cin,1,1) -> (Cin,Cmid), fold bn1 scale per out-channel.
    w1 = jnp.transpose(w1_oihw[:, :, 0, 0], (1, 0)) * s1[None, :]
    # conv2: OIHW -> HWIO (3,3,Cmid,Cout), fold bn2 scale, then (3, 3*Cmid, Cout)
    # with rows ordered (dx, ci) to match the kernel's channel concat.
    w2 = jnp.transpose(w2_oihw, (2, 3, 1, 0)) * s2[None, None, None, :]
    w2 = w2.reshape(3, 3 * Cmid, Cout)

    w1 = w1.astype(jnp.bfloat16)
    w2 = w2.astype(jnp.bfloat16)
    b1 = b1.reshape(1, Cmid).astype(jnp.float32)
    b2 = b2.reshape(1, Cout).astype(jnp.float32)

    out_nhwc = pl.pallas_call(
        basic_block_kernel,
        out_shape=jax.ShapeDtypeStruct((N, H, W, Cout), jnp.float32),
        grid_spec=pltpu.PrefetchScalarGridSpec(
            num_scalar_prefetch=0,
            grid=(N, n_ht),
            in_specs=[
                # main tile rows [i*tH, (i+1)*tH)
                pl.BlockSpec((1, tH, W, Cin), lambda n, i: (n, i, 0, 0)),
                # 1-row halo above (clamped at the top border)
                pl.BlockSpec((1, 1, W, Cin),
                             lambda n, i: (n, jnp.maximum(i * tH - 1, 0), 0, 0)),
                # 1-row halo below (clamped at the bottom border)
                pl.BlockSpec((1, 1, W, Cin),
                             lambda n, i: (n, jnp.minimum((i + 1) * tH, H - 1), 0, 0)),
                pl.BlockSpec((Cin, Cmid), lambda n, i: (0, 0)),
                pl.BlockSpec((1, Cmid), lambda n, i: (0, 0)),
                pl.BlockSpec((3, 3 * Cmid, Cout), lambda n, i: (0, 0, 0)),
                pl.BlockSpec((1, Cout), lambda n, i: (0, 0)),
            ],
            out_specs=pl.BlockSpec((1, tH, W, Cout), lambda n, i: (n, i, 0, 0)),
        ),
        compiler_params=pltpu.CompilerParams(
            dimension_semantics=("parallel", "parallel"),
            vmem_limit_bytes=vmem_limit,
        ),
    )(x, x, x, w1, b1, w2, b2)

    return jnp.transpose(out_nhwc, (0, 3, 1, 2))                   # back to NCHW


def basic_block_reference(x, w1, w2, g1, be1, m1, v1, g2, be2, m2, v2, eps=1e-5):
    """Pure-JAX NCHW reference (PyTorch eval-mode semantics, f32)."""
    def bn(y, g, b, m, v):
        s = (g / jnp.sqrt(v + eps)).reshape(1, -1, 1, 1)
        return y * s + (b - m * g / jnp.sqrt(v + eps)).reshape(1, -1, 1, 1)

    def leaky(y):
        return jnp.where(y > 0, y, 0.1 * y)

    dn = lax.conv_dimension_numbers(x.shape, w1.shape, ("NCHW", "OIHW", "NCHW"))
    out = lax.conv_general_dilated(x, w1, (1, 1), "VALID", dimension_numbers=dn)
    out = leaky(bn(out, g1, be1, m1, v1))
    dn2 = lax.conv_dimension_numbers(out.shape, w2.shape, ("NCHW", "OIHW", "NCHW"))
    out = lax.conv_general_dilated(out, w2, (1, 1), ((1, 1), (1, 1)),
                                   dimension_numbers=dn2)
    out = leaky(bn(out, g2, be2, m2, v2))
    return out + x


if __name__ == "__main__":
    key = jax.random.PRNGKey(0)
    ks = jax.random.split(key, 11)

    N, Cin, H, W = 2, 4, 16, 16
    planes = (2, 4)          # BasicBlock(inplanes=4, planes=[2, 4])
    Cmid, Cout = planes

    x = jax.random.normal(ks[0], (N, Cin, H, W), jnp.float32)

    # Deterministic synthetic parameters (shapes from the module __init__).
    w1 = jax.random.normal(ks[1], (Cmid, Cin, 1, 1), jnp.float32) * 0.3
    w2 = jax.random.normal(ks[2], (Cout, Cmid, 3, 3), jnp.float32) * 0.3
    g1 = jax.random.uniform(ks[3], (Cmid,), jnp.float32, 0.5, 1.5)
    be1 = jax.random.normal(ks[4], (Cmid,), jnp.float32) * 0.1
    m1 = jax.random.normal(ks[5], (Cmid,), jnp.float32) * 0.1
    v1 = jax.random.uniform(ks[6], (Cmid,), jnp.float32, 0.5, 1.5)
    g2 = jax.random.uniform(ks[7], (Cout,), jnp.float32, 0.5, 1.5)
    be2 = jax.random.normal(ks[8], (Cout,), jnp.float32) * 0.1
    m2 = jax.random.normal(ks[9], (Cout,), jnp.float32) * 0.1
    v2 = jax.random.uniform(ks[10], (Cout,), jnp.float32, 0.5, 1.5)

    # tile_h=8 -> 2 H-tiles per image: exercises the halo path (grid (2, 2)).
    out = basic_block_pallas(x, w1, w2, g1, be1, m1, v1, g2, be2, m2, v2,
                             tile_h=8)
    out = jax.block_until_ready(out)

    ref = basic_block_reference(x, w1, w2, g1, be1, m1, v1, g2, be2, m2, v2)
    ref = jax.block_until_ready(ref)

    assert out.shape == (N, Cout, H, W)
    max_err = float(jnp.max(jnp.abs(out - ref)))
    # bf16 inputs / MXU operands with f32 accumulation -> loosened tolerance.
    assert jnp.allclose(out, ref, atol=5e-2, rtol=5e-2), \
        f"max abs err = {max_err}"

    print("KERNEL_OK")
</pallas_src>

<mosaic_0001>
module attributes {stable_mosaic.version = 11 : i64} {
  func.func @basic_block_kernel(%arg0: i32, %arg1: i32, %arg2: memref<1x8x16x4xbf16, #tpu.memory_space<vmem>>, %arg3: memref<1x1x16x4xbf16, #tpu.memory_space<vmem>>, %arg4: memref<1x1x16x4xbf16, #tpu.memory_space<vmem>>, %arg5: memref<4x2xbf16, #tpu.memory_space<vmem>>, %arg6: memref<1x2xf32, #tpu.memory_space<vmem>>, %arg7: memref<3x6x4xbf16, #tpu.memory_space<vmem>>, %arg8: memref<1x4xf32, #tpu.memory_space<vmem>>, %arg9: memref<1x8x16x4xf32, #tpu.memory_space<vmem>>) attributes {dimension_semantics = [#tpu.dimension_semantics<parallel>, #tpu.dimension_semantics<parallel>], iteration_bounds = array<i64: 2, 2>, scalar_prefetch = 0 : i64, scratch_operands = 0 : i64, tpu.core_type = #tpu.core_type<tc>, window_params = [{transform_indices = @transform_0, window_bounds = array<i64: 1, 8, 16, 4>}, {transform_indices = @transform_1, window_bounds = array<i64: 1, 1, 16, 4>}, {transform_indices = @transform_2, window_bounds = array<i64: 1, 1, 16, 4>}, {pipeline_mode = #tpu.pipeline_mode<synchronous>, transform_indices = @transform_3, window_bounds = array<i64: 4, 2>}, {pipeline_mode = #tpu.pipeline_mode<synchronous>, transform_indices = @transform_4, window_bounds = array<i64: 1, 2>}, {pipeline_mode = #tpu.pipeline_mode<synchronous>, transform_indices = @transform_5, window_bounds = array<i64: 3, 6, 4>}, {pipeline_mode = #tpu.pipeline_mode<synchronous>, transform_indices = @transform_6, window_bounds = array<i64: 1, 4>}, {transform_indices = @transform_7, window_bounds = array<i64: 1, 8, 16, 4>}]} {
    %c0 = arith.constant 0 : index
    %c0_0 = arith.constant 0 : index
    %0 = vector.load %arg5[%c0, %c0_0] : memref<4x2xbf16, #tpu.memory_space<vmem>>, vector<4x2xbf16>
    %c0_1 = arith.constant 0 : index
    %c0_2 = arith.constant 0 : index
    %1 = vector.load %arg6[%c0_1, %c0_2] : memref<1x2xf32, #tpu.memory_space<vmem>>, vector<1x2xf32>
    %c0_3 = arith.constant 0 : index
    %c0_4 = arith.constant 0 : index
    %c0_5 = arith.constant 0 : index
    %c0_6 = arith.constant 0 : index
    %2 = vector.load %arg2[%c0_3, %c0_4, %c0_5, %c0_6] : memref<1x8x16x4xbf16, #tpu.memory_space<vmem>>, vector<1x8x16x4xbf16>
    %3 = vector.shape_cast %2 : vector<1x8x16x4xbf16> to vector<8x16x4xbf16>
    %4 = vector.shape_cast %3 : vector<8x16x4xbf16> to vector<128x4xbf16>
    %cst = arith.constant dense<0.000000e+00> : vector<128x2xf32>
    %5 = tpu.matmul %4, %0, %cst {dimension_numbers = #tpu.dot_dimension_numbers<[1], [0], [0], [1], [0, 0, 1, 1], [], []>} : vector<128x4xbf16>, vector<4x2xbf16>, vector<128x2xf32> -> vector<128x2xf32>
    %6 = vector.broadcast %1 : vector<1x2xf32> to vector<128x2xf32>
    %7 = arith.addf %5, %6 : vector<128x2xf32>
    %cst_7 = arith.constant 1.000000e-01 : f32
    %8 = vector.broadcast %cst_7 : f32 to vector<128x2xf32>
    %9 = arith.mulf %8, %7 : vector<128x2xf32>
    %10 = arith.maximumf %7, %9 : vector<128x2xf32>
    %11 = vector.shape_cast %10 : vector<128x2xf32> to vector<8x16x2xf32>
    %c0_8 = arith.constant 0 : index
    %c0_9 = arith.constant 0 : index
    %c0_10 = arith.constant 0 : index
    %c0_11 = arith.constant 0 : index
    %12 = vector.load %arg3[%c0_8, %c0_9, %c0_10, %c0_11] : memref<1x1x16x4xbf16, #tpu.memory_space<vmem>>, vector<1x1x16x4xbf16>
    %13 = vector.shape_cast %12 : vector<1x1x16x4xbf16> to vector<16x4xbf16>
    %c0_12 = arith.constant 0 : index
    %c0_13 = arith.constant 0 : index
    %c0_14 = arith.constant 0 : index
    %c0_15 = arith.constant 0 : index
    %14 = vector.load %arg4[%c0_12, %c0_13, %c0_14, %c0_15] : memref<1x1x16x4xbf16, #tpu.memory_space<vmem>>, vector<1x1x16x4xbf16>
    %15 = vector.shape_cast %14 : vector<1x1x16x4xbf16> to vector<16x4xbf16>
    %16 = tpu.concatenate %13, %15 in 0 : vector<16x4xbf16>, vector<16x4xbf16> -> vector<32x4xbf16>
    %cst_16 = arith.constant dense<0.000000e+00> : vector<32x2xf32>
    %17 = tpu.matmul %16, %0, %cst_16 {dimension_numbers = #tpu.dot_dimension_numbers<[1], [0], [0], [1], [0, 0, 1, 1], [], []>} : vector<32x4xbf16>, vector<4x2xbf16>, vector<32x2xf32> -> vector<32x2xf32>
    %18 = vector.broadcast %1 : vector<1x2xf32> to vector<32x2xf32>
    %19 = arith.addf %17, %18 : vector<32x2xf32>
    %cst_17 = arith.constant 1.000000e-01 : f32
    %20 = vector.broadcast %cst_17 : f32 to vector<32x2xf32>
    %21 = arith.mulf %20, %19 : vector<32x2xf32>
    %22 = arith.maximumf %19, %21 : vector<32x2xf32>
    %c0_i32 = arith.constant 0 : i32
    %23 = arith.cmpi sgt, %arg1, %c0_i32 : i32
    %24 = arith.extui %23 : i1 to i32
    %25 = arith.sitofp %24 : i32 to f32
    %c1_i32 = arith.constant 1 : i32
    %26 = arith.cmpi slt, %arg1, %c1_i32 : i32
    %27 = arith.extui %26 : i1 to i32
    %28 = arith.sitofp %27 : i32 to f32
    %29 = vector.extract_strided_slice %22 {offsets = [0, 0], sizes = [16, 2], strides = [1, 1]} : vector<32x2xf32> to vector<16x2xf32>
    %30 = vector.broadcast %25 : f32 to vector<16x2xf32>
    %31 = arith.mulf %29, %30 : vector<16x2xf32>
    %32 = vector.shape_cast %31 : vector<16x2xf32> to vector<1x16x2xf32>
    %33 = vector.extract_strided_slice %22 {offsets = [16, 0], sizes = [16, 2], strides = [1, 1]} : vector<32x2xf32> to vector<16x2xf32>
    %34 = vector.broadcast %28 : f32 to vector<16x2xf32>
    %35 = arith.mulf %33, %34 : vector<16x2xf32>
    %36 = vector.shape_cast %35 : vector<16x2xf32> to vector<1x16x2xf32>
    %37 = tpu.concatenate %32, %11, %36 in 0 : vector<1x16x2xf32>, vector<8x16x2xf32>, vector<1x16x2xf32> -> vector<10x16x2xf32>
    %cst_18 = arith.constant 0.000000e+00 : f32
    %38 = vector.broadcast %cst_18 : f32 to vector<10x1x2xf32>
    %39 = tpu.concatenate %38, %37, %38 in 1 : vector<10x1x2xf32>, vector<10x16x2xf32>, vector<10x1x2xf32> -> vector<10x18x2xf32>
    %40 = vector.extract_strided_slice %39 {offsets = [0, 0, 0], sizes = [10, 16, 2], strides = [1, 1, 1]} : vector<10x18x2xf32> to vector<10x16x2xf32>
    %41 = vector.extract_strided_slice %39 {offsets = [0, 1, 0], sizes = [10, 16, 2], strides = [1, 1, 1]} : vector<10x18x2xf32> to vector<10x16x2xf32>
    %42 = vector.extract_strided_slice %39 {offsets = [0, 2, 0], sizes = [10, 16, 2], strides = [1, 1, 1]} : vector<10x18x2xf32> to vector<10x16x2xf32>
    %43 = tpu.concatenate %40, %41, %42 in 2 : vector<10x16x2xf32>, vector<10x16x2xf32>, vector<10x16x2xf32> -> vector<10x16x6xf32>
    %44 = vector.shape_cast %43 : vector<10x16x6xf32> to vector<160x6xf32>
    %45 = arith.truncf %44 : vector<160x6xf32> to vector<160x6xbf16>
    %46 = vector.extract_strided_slice %45 {offsets = [0, 0], sizes = [128, 6], strides = [1, 1]} : vector<160x6xbf16> to vector<128x6xbf16>
    %c0_19 = arith.constant 0 : index
    %c0_20 = arith.constant 0 : index
    %c0_21 = arith.constant 0 : index
    %47 = vector.load %arg7[%c0_19, %c0_20, %c0_21] : memref<3x6x4xbf16, #tpu.memory_space<vmem>>, vector<1x6x4xbf16>
    %48 = vector.shape_cast %47 : vector<1x6x4xbf16> to vector<6x4xbf16>
    %cst_22 = arith.constant dense<0.000000e+00> : vector<128x4xf32>
    %49 = tpu.matmul %46, %48, %cst_22 {dimension_numbers = #tpu.dot_dimension_numbers<[1], [0], [0], [1], [0, 0, 1, 1], [], []>} : vector<128x6xbf16>, vector<6x4xbf16>, vector<128x4xf32> -> vector<128x4xf32>
    %50 = vector.extract_strided_slice %45 {offsets = [16, 0], sizes = [128, 6], strides = [1, 1]} : vector<160x6xbf16> to vector<128x6xbf16>
    %c1 = arith.constant 1 : index
    %c0_23 = arith.constant 0 : index
    %c0_24 = arith.constant 0 : index
    %51 = vector.load %arg7[%c1, %c0_23, %c0_24] : memref<3x6x4xbf16, #tpu.memory_space<vmem>>, vector<1x6x4xbf16>
    %52 = vector.shape_cast %51 : vector<1x6x4xbf16> to vector<6x4xbf16>
    %cst_25 = arith.constant dense<0.000000e+00> : vector<128x4xf32>
    %53 = tpu.matmul %50, %52, %cst_25 {dimension_numbers = #tpu.dot_dimension_numbers<[1], [0], [0], [1], [0, 0, 1, 1], [], []>} : vector<128x6xbf16>, vector<6x4xbf16>, vector<128x4xf32> -> vector<128x4xf32>
    %54 = arith.addf %49, %53 : vector<128x4xf32>
    %55 = vector.extract_strided_slice %45 {offsets = [32, 0], sizes = [128, 6], strides = [1, 1]} : vector<160x6xbf16> to vector<128x6xbf16>
    %c2 = arith.constant 2 : index
    %c0_26 = arith.constant 0 : index
    %c0_27 = arith.constant 0 : index
    %56 = vector.load %arg7[%c2, %c0_26, %c0_27] : memref<3x6x4xbf16, #tpu.memory_space<vmem>>, vector<1x6x4xbf16>
    %57 = vector.shape_cast %56 : vector<1x6x4xbf16> to vector<6x4xbf16>
    %cst_28 = arith.constant dense<0.000000e+00> : vector<128x4xf32>
    %58 = tpu.matmul %55, %57, %cst_28 {dimension_numbers = #tpu.dot_dimension_numbers<[1], [0], [0], [1], [0, 0, 1, 1], [], []>} : vector<128x6xbf16>, vector<6x4xbf16>, vector<128x4xf32> -> vector<128x4xf32>
    %59 = arith.addf %54, %58 : vector<128x4xf32>
    %c0_29 = arith.constant 0 : index
    %c0_30 = arith.constant 0 : index
    %60 = vector.load %arg8[%c0_29, %c0_30] : memref<1x4xf32, #tpu.memory_space<vmem>>, vector<1x4xf32>
    %61 = vector.broadcast %60 : vector<1x4xf32> to vector<128x4xf32>
    %62 = arith.addf %59, %61 : vector<128x4xf32>
    %cst_31 = arith.constant 1.000000e-01 : f32
    %63 = vector.broadcast %cst_31 : f32 to vector<128x4xf32>
    %64 = arith.mulf %63, %62 : vector<128x4xf32>
    %65 = arith.maximumf %62, %64 : vector<128x4xf32>
    %66 = vector.shape_cast %65 : vector<128x4xf32> to vector<8x16x4xf32>
    %67 = arith.extf %3 : vector<8x16x4xbf16> to vector<8x16x4xf32>
    %68 = arith.addf %66, %67 : vector<8x16x4xf32>
    %c0_32 = arith.constant 0 : index
    %c0_33 = arith.constant 0 : index
    %c0_34 = arith.constant 0 : index
    %c0_35 = arith.constant 0 : index
    %69 = vector.load %arg9[%c0_32, %c0_33, %c0_34, %c0_35] : memref<1x8x16x4xf32, #tpu.memory_space<vmem>>, vector<1x8x16x4xf32>
    %70 = vector.shape_cast %69 : vector<1x8x16x4xf32> to vector<8x16x4xf32>
    %71 = vector.shape_cast %68 : vector<8x16x4xf32> to vector<1x8x16x4xf32>
    tpu.vector_store %arg9[%c0_32, %c0_33, %c0_34, %c0_35], %71 {strides = array<i32>} : memref<1x8x16x4xf32, #tpu.memory_space<vmem>>, vector<1x8x16x4xf32>,
    return
  }
  func.func @transform_0(%arg0: i32, %arg1: i32) -> (i32, i32, i32, i32) {
    %c0_i32 = arith.constant 0 : i32
    %c0_i32_0 = arith.constant 0 : i32
    %c0_i32_1 = arith.constant 0 : i32
    return %arg0, %arg1, %c0_i32, %c0_i32_0 : i32, i32, i32, i32
  }
  func.func @transform_1(%arg0: i32, %arg1: i32) -> (i32, i32, i32, i32) {
    %c8_i32 = arith.constant 8 : i32
    %0 = arith.muli %arg1, %c8_i32 : i32
    %c1_i32 = arith.constant 1 : i32
    %1 = arith.subi %0, %c1_i32 : i32
    %c0_i32 = arith.constant 0 : i32
    %2 = arith.maxsi %1, %c0_i32 : i32
    %c0_i32_0 = arith.constant 0 : i32
    %c0_i32_1 = arith.constant 0 : i32
    %c0_i32_2 = arith.constant 0 : i32
    return %arg0, %2, %c0_i32_0, %c0_i32_1 : i32, i32, i32, i32
  }
  func.func @transform_2(%arg0: i32, %arg1: i32) -> (i32, i32, i32, i32) {
    %c1_i32 = arith.constant 1 : i32
    %0 = arith.addi %arg1, %c1_i32 : i32
    %c8_i32 = arith.constant 8 : i32
    %1 = arith.muli %0, %c8_i32 : i32
    %c15_i32 = arith.constant 15 : i32
    %2 = arith.minsi %1, %c15_i32 : i32
    %c0_i32 = arith.constant 0 : i32
    %c0_i32_0 = arith.constant 0 : i32
    %c0_i32_1 = arith.constant 0 : i32
    return %arg0, %2, %c0_i32, %c0_i32_0 : i32, i32, i32, i32
  }
  func.func @transform_3(%arg0: i32, %arg1: i32) -> (i32, i32) {
    %c0_i32 = arith.constant 0 : i32
    %c0_i32_0 = arith.constant 0 : i32
    %c0_i32_1 = arith.constant 0 : i32
    return %c0_i32, %c0_i32_0 : i32, i32
  }
  func.func @transform_4(%arg0: i32, %arg1: i32) -> (i32, i32) {
    %c0_i32 = arith.constant 0 : i32
    %c0_i32_0 = arith.constant 0 : i32
    %c0_i32_1 = arith.constant 0 : i32
    return %c0_i32, %c0_i32_0 : i32, i32
  }
  func.func @transform_5(%arg0: i32, %arg1: i32) -> (i32, i32, i32) {
    %c0_i32 = arith.constant 0 : i32
    %c0_i32_0 = arith.constant 0 : i32
    %c0_i32_1 = arith.constant 0 : i32
    %c0_i32_2 = arith.constant 0 : i32
    return %c0_i32, %c0_i32_0, %c0_i32_1 : i32, i32, i32
  }
  func.func @transform_6(%arg0: i32, %arg1: i32) -> (i32, i32) {
    %c0_i32 = arith.constant 0 : i32
    %c0_i32_0 = arith.constant 0 : i32
    %c0_i32_1 = arith.constant 0 : i32
    return %c0_i32, %c0_i32_0 : i32, i32
  }
  func.func @transform_7(%arg0: i32, %arg1: i32) -> (i32, i32, i32, i32) {
    %c0_i32 = arith.constant 0 : i32
    %c0_i32_0 = arith.constant 0 : i32
    %c0_i32_1 = arith.constant 0 : i32
    return %arg0, %arg1, %c0_i32, %c0_i32_0 : i32, i32, i32, i32
  }
}

</mosaic_0001>

<bundles_post_ra>
// kernel: tpu_custom_call.1
= control target key start
LH: loop header
LB: loop body
LE: loop exit
PB: predicated region body
PF: predicated region fallthrough
CT: control target
= control target key end

     0   :  { %s2216_s24 = smov 0   ;;  %s2218_s25 = smov 0   ;;  %s2789_s0 = inlined_call_operand.vmem [shape: bf16[2,16,16,4], index: 0, kind: input, shape index: {}]   ;;  %s2790_s1 = inlined_call_operand.vmem [shape: bf16[2,16,16,4], index: 1, kind: input, shape index: {}]   ;;  %s2791_s2 = inlined_call_operand.vmem [shape: bf16[2,16,16,4], index: 2, kind: input, shape index: {}]   ;;  %s2792_s3 = inlined_call_operand.vmem [shape: bf16[4,2], index: 3, kind: input, shape index: {}]   ;;  %s2793_s4 = inlined_call_operand.vmem [shape: f32[1,2], index: 4, kind: input, shape index: {}]   ;;  %s2794_s5 = inlined_call_operand.vmem [shape: bf16[3,6,4], index: 5, kind: input, shape index: {}]   ;;  %s2795_s6 = inlined_call_operand.vmem [shape: f32[1,4], index: 6, kind: input, shape index: {}]   ;;  %s2796_s7 = inlined_call_operand.vmem [shape: f32[2,16,16,4], index: 7, kind: output, shape index: {}]  }
   0x1   :  { %s2220_s26 = smov 0   ;;  %s2222_s27 = smov 0  }
   0x2   :  { %s2224_s28 = smov 0  }
   0x3 LB: > { %s26_s29 = sadd.s32 1, %s2164_s26  ;;  %s29_s30 = sadd.s32 1, %s2168_s27  ;;  %s2172_s28 = sphi %s2224_s28, %s17_s28   ;;  %s2168_s27 = sphi %s2222_s27, %s2801_s27   ;;  %s2164_s26 = sphi %s2220_s26, %s2800_s26   ;;  %s2160_s25 = sphi %s2218_s25, %s2799_s25   ;;  %s2156_s24 = sphi %s2216_s24, %s2798_s24  }
   0x4   : > { %p27_p0 = scmp.ge.s32.totalorder %s26_s29, 2  ;;  %p1760_p1 = scmp.ge.s32.totalorder %s2172_s28, 1 }
   0x5   : > { %p323_p2 = scmp.lt.s32.totalorder %s2172_s28, 5 }
   0x6   : > { %s2803_s29 = smov (%p27_p0, %s26_s29), 0  ;;  %s2805_s30 = smov (!%p27_p0, %s29_s30), %s2168_s27 }
   0x7   : > { %p324_p3 = pnand %p1760_p1, %p323_p2  ;;  %p31_p4 = scmp.ge.s32.totalorder %s2805_s30, 2 }
   0x8   : > { %s1761_s10 = sshll.u32 (!%p324_p3), %s2156_s24, 3  ;;  %p392_p5 = scmp.lt.s32.totalorder (!%p324_p3), %s2160_s25, 1 }
   0x9   : > { %s2807_s30 = smov (%p31_p4, %s2805_s30), 0  ;;  %327 = sbr.rel (%p324_p3) target bundleno = 644 (0x284), region = 48 }
   0xa   : > { %p394_p6 = scmp.lt.s32.totalorder (!%p324_p3), %s1761_s10, 15  ;;  %s1766_s11 = sadd.s32 (!%p324_p3), 4294967295, %s1761_s10 }
   0xb   : > { %p404_p7 = scmp.gt.s32.totalorder (!%p324_p3), %s1766_s11, 0  ;;  %p1767_p8 = scmp.lt.s32.totalorder (!%p324_p3), %s1766_s11, 15 }
   0xc   : > { %s1843_s17 = sadd.s32 (!%p324_p3), 8, %s1761_s10  ;;  %p750_p10 = scmp.lt.s32.totalorder (!%p324_p3), %s2156_s24, 1 }
   0xd   : > { %p2266_p9 = scmp.lt.s32.totalorder (!%p324_p3), %s1843_s17, 15  ;;  %p747_p11 = scmp.gt.s32.totalorder (!%p324_p3), %s2156_s24, 0 }
   0xe   : > { %v448_v0 = vld [vmem:[%s2792_s3] sm:$0x3]  ;;  %vm537_vm0 = vcmask 1041408   ;;  %s2809_s25 = smov (!%p392_p5, %s2160_s25), 1  ;;  %vm512_vm1 = vcmask 31744   ;;  %s2811_s11 = smov (!%p404_p7, %s1766_s11), 0 }
   0xf   : > { %1961 = vmatprep.subr.msk.bf16.mxu0 %vm537_vm0, %v448_v0  ;;  %v539_v1 = vsel %vm537_vm0, %v448_v0, 0  ;;  %1962 = vmatprep.subr.msk.bf16.mxu1 %vm537_vm0, %v448_v0  ;;  %s395_s12 = scalar_select %p394_p6, %s1761_s10, 15  ;;  %v2300_v13 = vld [vmem:[%s2793_s4] ss:$0 sm:$0xff]  ;;  %vm779_vm2 = vcmask 1040384   ;;  %vm991_vm3 = vcmask 1045504  }
  0x10   : > { %1884 = vmatpush3.bf16.msra.mxu0 %v539_v1  ;;  %1902 = vmatpush3.bf16.msra.mxu1 %v539_v1  ;;  %s2252_s13 = sshll.u32 %s2809_s25, 5  ;;  %s2813_s11 = smov (!%p1767_p8, %s2811_s11), 15  ;;  %vm880_vm4 = vcmask 1046528   ;;  %vm1181_vm5 = vcmask 1042432   ;;  %vm1102_vm6 = vcmask 15360   ;;  %vm1156_vm7 = vcmask 48128  }
  0x11   : > { %s1762_s14 = sshll.u32 %s395_s12, 1  ;;  %s2815_s17 = smov (!%p2266_p9, %s1843_s17), 15 }
  0x12   : > { %s2255_s15 = sadd.s32 %s2252_s13, %s1762_s14  ;;  %s1772_s22 = sshll.u32 %s2813_s11, 1 }
  0x13   : > { %s1764_s16 = sshll.u32 %s2255_s15, 2  ;;  %s412_s23 = sadd.s32 %s1772_s22, %s2252_s13 }
  0x14   : > { %s2261_s20 = scalar_lea.vmem %s2789_s0, %s1764_s16  ;;  %s1774_s25 = sshll.u32 %s412_s23, 2 }
  0x15   : > { %v450_v2 = vld [vmem:[%s2261_s20] sm:$0xff]   ;;  %v452_v3 = vld [vmem:[%s2261_s20 + $0x8] sm:$0xff]   ;;  %v454_v4 = vld [vmem:[%s2261_s20 + $0x10] sm:$0xff]   ;;  %s414_s10 = scalar_lea.vmem %s2790_s1, %s1774_s25  ;;  %s2817_s17 = smov (!%p2266_p9, %s2815_s17), 15 }
  0x16   : > { %1885 = vmatprep.mubr.msk.bf16.mxu0 %vm512_vm1, %v450_v2  ;;  %v456_v5 = vld [vmem:[%s2261_s20 + $0x18] sm:$0xff]   ;;  %v458_v6 = vld [vmem:[%s2261_s20 + $0x20] sm:$0xff]   ;;  %s1779_s12 = sshll.u32 %s2817_s17, 1  ;;  %v460_v8 = vld [vmem:[%s2261_s20 + $0x28] sm:$0xff]   ;;  %s2174_s25 = smov 4  }
  0x17   : > { %1886 = vmatmul.mubr.msk.bf16.vlgmr.msra.gmra.mxu0 %vm512_vm1, %v452_v3  ;;  %v2114_v7 = vld [vmem:[%s414_s10] sm:$0xff]   ;;  %s429_s14 = sadd.s32 %s1779_s12, %s2252_s13  ;;  %v462_v9 = vld [vmem:[%s2261_s20 + $0x30] sm:$0xff]   ;;  %v464_v11 = vld [vmem:[%s2261_s20 + $0x38] sm:$0xff]   ;;  %s2175_s8 = smov 2  }
  0x18   : > { %1889 = vmatprep.mubr.msk.bf16.mxu0 %vm512_vm1, %v454_v4  ;;  %1903 = vmatprep.mubr.msk.bf16.mxu1 %vm512_vm1, %v2114_v7  ;;  %s1781_s11 = sshll.u32 %s429_s14, 2  ;;  %s1785_s13 = sshll.u32 %s2255_s15, 3 }
  0x19   : > { %s431_s19 = scalar_lea.vmem %s2791_s2, %s1781_s11  ;;  %s2713_s15 = scalar_lea.vmem %s2796_s7, %s1785_s13 }
  0x1a   : > { %v2116_v10 = vld [vmem:[%s431_s19] sm:$0xff]   ;;  %s2310_s21 = scalar_select %p750_p10, 1, 0 }
  0x1b   : > { %1904 = vmatmul.mubr.msk.bf16.vlgmr.msra.gmra.mxu1 %vm512_vm1, %v2116_v10  ;;  %s2313_s22 = scalar_select %p747_p11, 1, 0 }
  0x1c   : > { %s752_s24 = scvt.s32.f32 %s2310_s21 }
  0x1d   : > { %s749_s23 = scvt.s32.f32 %s2313_s22 }
  0x1e   : > { %v2332_v1 = vstv %s752_s24 }
  0x1f   : > { %1890 = vmatmul.mubr.msk.bf16.gmra.mxu0 %vm512_vm1, %v456_v5  ;;  %v2335_v5 = vstv %s749_s23 }
  0x20   : > { %1893 = vmatprep.mubr.msk.bf16.mxu0 %vm512_vm1, %v458_v6 }
  0x27   : > { %1894 = vmatmul.mubr.msk.bf16.gmra.mxu0 %vm512_vm1, %v460_v8 }
  0x28   : > { %1897 = vmatprep.mubr.msk.bf16.mxu0 %vm512_vm1, %v462_v9 }
  0x2f   : > { %1898 = vmatmul.mubr.msk.bf16.gmra.mxu0 %vm512_vm1, %v464_v11 }
  0xd7   : > { %v1887_v12 = vpop.f32.mrf.mxu0 }
  0xd8   : > { %v584_v20 = vadd.f32 %v1887_v12, %v2300_v13 }
  0xd9   : > { %v575_v14 = vpop.f32.mrf.mxu0 }
  0xda   : > { %v576_v15 = vadd.f32 %v2300_v13, %v575_v14  ;;  %v640_v29 = vmul.f32 0.1, %v584_v20 }
  0xdb   : > { %v1888_v16 = vpop.f32.mrf.mxu0  ;;  %v1905_v10 = vpop.f32.mrf.mxu1 }
  0xdc   : > { %v638_v17 = vmul.f32 0.1, %v576_v15  ;;  %v587_v23 = vadd.f32 %v1888_v16, %v2300_v13  ;;  %v656_v40 = vmax.f32 %v584_v20, %v640_v29 }
  0xdd   : > { %v578_v18 = vpop.f32.mrf.mxu0  ;;  %v724_v29 = vpop.f32.mrf.mxu1 }
  0xde   : > { %v579_v19 = vadd.f32 %v2300_v13, %v578_v18  ;;  %v654_v22 = vmax.f32 %v576_v15, %v638_v17  ;;  %v641_v32 = vmul.f32 0.1, %v587_v23  ;;  %v786_v52 = vrot.slane %v656_v40, 7 }
  0xdf   : > { %v1891_v21 = vpop.f32.mrf.mxu0 }
  0xe0   : > { %v639_v24 = vmul.f32 0.1, %v579_v19  ;;  %v600_v27 = vadd.f32 %v1891_v21, %v2300_v13  ;;  %v783_v31 = vrot.slane %v654_v22, 7  ;;  %v657_v45 = vmax.f32 %v587_v23, %v641_v32 }
  0xe1   : > { %v591_v25 = vpop.f32.mrf.mxu0  ;;  %v2338_v6 = vsel %vm779_vm2, 0.0, %v786_v52  ;;  %v2362_v32 = vadd.f32 %v1905_v10, %v2300_v13 }
  0xe2   : > { %v655_v26 = vmax.f32 %v579_v19, %v639_v24  ;;  %v592_v28 = vadd.f32 %v2300_v13, %v591_v25  ;;  %v644_v38 = vmul.f32 0.1, %v600_v27  ;;  %v2321_v44 = vsel %vm779_vm2, 0.0, %v783_v31 }
  0xe3   : > { %v1892_v30 = vpop.f32.mrf.mxu0  ;;  %v997_v56 = vrot.slane %v2321_v44, 2  ;;  %v787_v57 = vrot.slane %v657_v45, 7  ;;  %v886_v4 = vrot.slane %v2321_v44, 1  ;;  %v891_v21 = vrot.slane %v2338_v6, 1 }
  0xe4   : > { %v784_v33 = vrot.slane %v655_v26, 7  ;;  %v603_v34 = vadd.f32 %v1892_v30, %v2300_v13  ;;  %v642_v39 = vmul.f32 0.1, %v592_v28  ;;  %v660_v50 = vmax.f32 %v600_v27, %v644_v38 }
  0xe5   : > { %v594_v35 = vpop.f32.mrf.mxu0  ;;  %v2341_v11 = vsel %vm779_vm2, %v786_v52, %v787_v57  ;;  %v852_v16 = vsel %vm779_vm2, %v787_v57, 0.0  ;;  %v1002_v22 = vrot.slane %v2338_v6, 2 }
  0xe6   : > { %v2316_v36 = vsel %vm779_vm2, %v783_v31, %v784_v33  ;;  %v851_v37 = vsel %vm779_vm2, %v784_v33, 0.0  ;;  %v645_v41 = vmul.f32 0.1, %v603_v34  ;;  %v595_v42 = vadd.f32 %v2300_v13, %v594_v35 }
  0xe7   : > { %v1895_v43 = vpop.f32.mrf.mxu0  ;;  %v1000_v46 = vrot.slane %v851_v37, 2  ;;  %v998_v49 = vrot.slane %v2316_v36, 2  ;;  %v658_v51 = vmax.f32 %v592_v28, %v642_v39  ;;  %v889_v58 = vrot.slane %v851_v37, 1 }
  0xe8   : > { %v616_v47 = vadd.f32 %v1895_v43, %v2300_v13  ;;  %v661_v53 = vmax.f32 %v603_v34, %v645_v41  ;;  %v643_v54 = vmul.f32 0.1, %v595_v42  ;;  %v887_v60 = vrot.slane %v2316_v36, 1 }
  0xe9   : > { %v607_v48 = vpop.f32.mrf.mxu0  ;;  %v999_v62 = vsel %vm991_vm3, %v997_v56, %v998_v49  ;;  %v1001_v63 = vsel %vm991_vm3, %v998_v49, %v1000_v46  ;;  %v792_v2 = vrot.slane %v660_v50, 7  ;;  %v789_v3 = vrot.slane %v658_v51, 7  ;;  %v1906_v49 = vpop.f32.mrf.mxu1 }
  0xea   : > { %v608_v59 = vadd.f32 %v2300_v13, %v607_v48  ;;  %v648_v61 = vmul.f32 0.1, %v616_v47  ;;  %v793_v7 = vrot.slane %v661_v53, 7  ;;  %v659_v8 = vmax.f32 %v595_v42, %v643_v54 }
  0xeb   : > { %v1896_v55 = vpop.f32.mrf.mxu0  ;;  %v2018_v12 = vpack.i.bf16 %v1001_v63, %v999_v62  ;;  %v888_v14 = vsel %vm880_vm4, %v886_v4, %v887_v60  ;;  %v890_v15 = vsel %vm880_vm4, %v887_v60, %v889_v58  ;;  %v2350_v23 = vsel %vm779_vm2, 0.0, %v792_v2 }
  0xec   : > { %v646_v9 = vmul.f32 0.1, %v608_v59  ;;  %v664_v17 = vmax.f32 %v616_v47, %v648_v61  ;;  %v619_v18 = vadd.f32 %v1896_v55, %v2300_v13  ;;  %v2008_v19 = vpack.i.bf16 %v890_v15, %v888_v14 }
  0xed   : > { %v610_v0 = vpop.f32.mrf.mxu0  ;;  %v2353_v24 = vsel %vm779_vm2, 0.0, %v789_v3  ;;  %2019 = vrot.lane.b32.xlu1 %v2018_v12, %s2174_s25  ;;  %v2357_v25 = vsel %vm779_vm2, %v793_v7, 0.0  ;;  %v790_v26 = vrot.slane %v659_v8, 7  ;;  %v894_v30 = vrot.slane %v852_v16, 1 }
  0xee   : > { %v662_v27 = vmax.f32 %v608_v59, %v646_v9  ;;  %2009 = vrot.lane.b32.xlu0 %v2008_v19, %s2175_s8  ;;  %v611_v28 = vadd.f32 %v2300_v13, %v610_v0  ;;  %v1005_v31 = vrot.slane %v852_v16, 2  ;;  %v1003_v33 = vrot.slane %v2341_v11, 2 }
  0xef   : > { %v1899_v20 = vpop.f32.mrf.mxu0  ;;  %v901_v34 = vrot.slane %v2350_v23, 1  ;;  %v1012_v35 = vrot.slane %v2350_v23, 2  ;;  %v798_v37 = vrot.slane %v664_v17, 7  ;;  %v649_v38 = vmul.f32 0.1, %v619_v18 }
  0xf0   : > { %v896_v40 = vrot.slane %v2353_v24, 1  ;;  %v1007_v41 = vrot.slane %v2353_v24, 2  ;;  %v2370_v42 = vsel %vm779_vm2, %v792_v2, %v793_v7  ;;  %v904_v43 = vrot.slane %v2357_v25, 1  ;;  %v727_v7 = vpop.f32.mrf.mxu1 }
  0xf1   : > { %v623_v39 = vpop.f32.mrf.mxu0  ;;  %v2374_v45 = vsel %vm779_vm2, %v790_v26, 0.0  ;;  %v2376_v46 = vrot.slane %v662_v27, 7  ;;  %v647_v47 = vmul.f32 0.1, %v611_v28  ;;  %v892_v48 = vrot.slane %v2341_v11, 1 }
  0xf2   : > { %v632_v50 = vadd.f32 %v1899_v20, %v2300_v13  ;;  %v725_v51 = vadd.f32 %v2300_v13, %v724_v29  ;;  %v1004_v52 = vsel %vm991_vm3, %v1002_v22, %v1003_v33  ;;  %v1006_v53 = vsel %vm991_vm3, %v1003_v33, %v1005_v31 }
  0xf3   : > { %v1015_v54 = vrot.slane %v2357_v25, 2  ;;  %v2385_v55 = vsel %vm779_vm2, 0.0, %v798_v37  ;;  %v665_v56 = vmax.f32 %v619_v18, %v649_v38  ;;  %v2023_v57 = vpack.i.bf16 %v1006_v53, %v1004_v52  ;;  %v1900_v58 = vpop.f32.mrf.mxu0 }
  0xf4   : > { %v2388_v59 = vsel %vm779_vm2, %v789_v3, %v790_v26  ;;  %v899_v60 = vrot.slane %v2374_v45, 1  ;;  %v1010_v61 = vrot.slane %v2374_v45, 2  ;;  %v741_v62 = vmul.f32 0.1, %v2362_v32 }
  0xf5   : > { %v663_v63 = vmax.f32 %v611_v28, %v647_v47  ;;  %2024 = vrot.lane.b32.xlu1 %v2023_v57, %s2174_s25  ;;  %v893_v0 = vsel %vm880_vm4, %v891_v21, %v892_v48  ;;  %v895_v2 = vsel %vm880_vm4, %v892_v48, %v894_v30  ;;  %v624_v4 = vadd.f32 %v2300_v13, %v623_v39  ;;  %v626_v17 = vpop.f32.mrf.mxu0 }
  0xf6   : > { %v911_v8 = vrot.slane %v2385_v55, 1  ;;  %v2400_v3 = vsel %vm779_vm2, 0.0, %v2376_v46  ;;  %v652_v9 = vmul.f32 0.1, %v632_v50  ;;  %v739_v10 = vmul.f32 0.1, %v725_v51 }
  0xf7   : > { %v1022_v12 = vrot.slane %v2385_v55, 2  ;;  %v799_v14 = vrot.slane %v665_v56, 7  ;;  %v2013_v15 = vpack.i.bf16 %v895_v2, %v893_v0  ;;  %v650_v16 = vmul.f32 0.1, %v624_v4 }
  0xf8   : > { %v745_v18 = vmax.f32 %v2362_v32, %v741_v62  ;;  %v736_v19 = vadd.f32 %v1906_v49, %v2300_v13  ;;  %v635_v20 = vadd.f32 %v1900_v58, %v2300_v13  ;;  %v728_v21 = vadd.f32 %v2300_v13, %v727_v7 }
  0xf9   : > { %v906_v22 = vrot.slane %v2400_v3, 1  ;;  %v1017_v26 = vrot.slane %v2400_v3, 2  ;;  %v796_v27 = vrot.slane %v663_v63, 7  ;;  %2014 = vrot.lane.b32.xlu0 %v2013_v15, %s2175_s8  ;;  %v902_v28 = vrot.slane %v2370_v42, 1 }
  0xfa   : > { %v668_v29 = vmax.f32 %v632_v50, %v652_v9  ;;  %v743_v30 = vmax.f32 %v725_v51, %v739_v10  ;;  %v653_v31 = vmul.f32 0.1, %v635_v20  ;;  %v627_v32 = vadd.f32 %v2300_v13, %v626_v17 }
  0xfb   : > { %v666_v33 = vmax.f32 %v624_v4, %v650_v16  ;;  %v903_v38 = vsel %vm880_vm4, %v901_v34, %v902_v28  ;;  %v905_v39 = vsel %vm880_vm4, %v902_v28, %v904_v43  ;;  %v897_v47 = vrot.slane %v2388_v59, 1 }
  0xfc   : > { %v742_v48 = vmul.f32 0.1, %v736_v19  ;;  %v669_v49 = vmax.f32 %v635_v20, %v653_v31  ;;  %v740_v52 = vmul.f32 0.1, %v728_v21  ;;  %v2028_v53 = vpack.i.bf16 %v905_v39, %v903_v38 }
  0xfd   : > { %v2416_v56 = vsel %vm779_vm2, %v798_v37, %v799_v14  ;;  %v898_v50 = vsel %vm880_vm4, %v896_v40, %v897_v47  ;;  %v900_v51 = vsel %vm880_vm4, %v897_v47, %v899_v60  ;;  %v651_v57 = vmul.f32 0.1, %v627_v32 }
  0xfe   : > { %v856_v13 = vsel %vm779_vm2, %v799_v14, 0.0  ;;  %v2422_v34 = vsel %vm779_vm2, %v796_v27, 0.0  ;;  %v2425_v43 = vmul.f32 %v2332_v1, %v745_v18  ;;  %v805_v58 = vrot.slane %v669_v49, 7  ;;  %2029 = vrot.lane.b32.xlu1 %v2028_v53, %s2175_s8 }
  0xff   : > { %v804_v62 = vrot.slane %v668_v29, 7  ;;  %v2038_v63 = vpack.i.bf16 %v900_v51, %v898_v50  ;;  %v667_v37 = vmax.f32 %v627_v32, %v651_v57  ;;  %v1013_v0 = vrot.slane %v2370_v42, 2 }
 0x100   : > { %v2430_v40 = vmul.f32 %v2335_v5, %v743_v30  ;;  %v801_v60 = vrot.slane %v666_v33, 7  ;;  %v746_v2 = vmax.f32 %v736_v19, %v742_v48  ;;  %v744_v4 = vmax.f32 %v728_v21, %v740_v52 }
 0x101   : > { %v914_v7 = vrot.slane %v856_v13, 1  ;;  %v1025_v9 = vrot.slane %v856_v13, 2  ;;  %v2434_v10 = vsel %vm779_vm2, %v2376_v46, %v796_v27  ;;  %2039 = vrot.lane.b32.xlu0 %v2038_v63, %s2175_s8  ;;  %v1008_v14 = vrot.slane %v2388_v59, 2 }
 0x102   : > { %v807_v15 = vrot.slane %v2425_v43, 7  ;;  %v2440_v16 = vsel %vm779_vm2, %v805_v58, 0.0  ;;  %v1014_v17 = vsel %vm991_vm3, %v1012_v35, %v1013_v0  ;;  %v1016_v18 = vsel %vm991_vm3, %v1013_v0, %v1015_v54 }
 0x103   : > { %v909_v46 = vrot.slane %v2422_v34, 1  ;;  %v1020_v19 = vrot.slane %v2422_v34, 2  ;;  %v2451_v20 = vsel %vm779_vm2, 0.0, %v804_v62  ;;  %v802_v21 = vrot.slane %v667_v37, 7 }
 0x104   : > { %v780_v27 = vrot.slane %v2430_v40, 7  ;;  %v2455_v28 = vsel %vm779_vm2, 0.0, %v801_v60  ;;  %v2458_v29 = vmul.f32 %v2332_v1, %v746_v2  ;;  %v755_v25 = vmul.f32 %v2335_v5, %v744_v4 }
 0x105   : > { %v2462_v35 = vsel %vm779_vm2, %v804_v62, %v805_v58  ;;  %v924_v54 = vrot.slane %v2440_v16, 1  ;;  %v2033_v30 = vpack.i.bf16 %v1016_v18, %v1014_v17  ;;  %v1009_v31 = vsel %vm991_vm3, %v1007_v41, %v1008_v14 }
 0x106   : > { %v1011_v32 = vsel %vm991_vm3, %v1008_v14, %v1010_v61  ;;  %v912_v33 = vrot.slane %v2416_v56, 1  ;;  %v907_v1 = vrot.slane %v2434_v10, 1  ;;  %v1023_v5 = vrot.slane %v2416_v56, 2 }
 0x107   : > { %v2475_v38 = vsel %vm779_vm2, %v801_v60, %v802_v21  ;;  %v2478_v39 = vsel %vm779_vm2, %v802_v21, 0.0  ;;  %2034 = vrot.lane.b32.xlu1 %v2033_v30, %s2174_s25  ;;  %v2043_v47 = vpack.i.bf16 %v1011_v32, %v1009_v31  ;;  %v1018_v41 = vrot.slane %v2434_v10, 2  ;;  %v1153_v21 = vld [vmem:[%s2794_s5] sm:$0x7]  ;;  %v1824_v30 = vld [vmem:[%s2794_s5 + $0x8] sm:$0x7] }
 0x108   : > { %v913_v45 = vsel %vm880_vm4, %v911_v8, %v912_v33  ;;  %v915_v61 = vsel %vm880_vm4, %v912_v33, %v914_v7  ;;  %v908_v48 = vsel %vm880_vm4, %v906_v22, %v907_v1  ;;  %v910_v49 = vsel %vm880_vm4, %v907_v1, %v909_v46  ;;  %1964 = vmatprep.subr.msk.bf16.mxu0 %vm1181_vm5, %v1153_v21 }
 0x109   : > { %v781_v52 = vrot.slane %v755_v25, 7  ;;  %2044 = vrot.lane.b32.xlu0 %v2043_v47, %s2174_s25  ;;  %v2048_v53 = vpack.i.bf16 %v915_v61, %v913_v45  ;;  %v2058_v50 = vpack.i.bf16 %v910_v49, %v908_v48  ;;  %v922_v51 = vrot.slane %v2462_v35, 1 }
 0x10a   : > { %v919_v57 = vrot.slane %v2478_v39, 1  ;;  %v1024_v8 = vsel %vm991_vm3, %v1022_v12, %v1023_v5  ;;  %v1026_v13 = vsel %vm991_vm3, %v1023_v5, %v1025_v9  ;;  %v917_v34 = vrot.slane %v2475_v38, 1 }
 0x10b   : > { %v2501_v22 = vsel %vm779_vm2, 0.0, %v807_v15  ;;  %v921_v58 = vrot.slane %v2451_v20, 1  ;;  %v2505_v62 = vsel %vm779_vm2, 0.0, %v780_v27  ;;  %2049 = vrot.lane.b32.xlu1 %v2048_v53, %s2175_s8  ;;  %v916_v63 = vrot.slane %v2455_v28, 1 }
 0x10c   : > { %v808_v12 = vrot.slane %v2458_v29, 7  ;;  %v1019_v37 = vsel %vm991_vm3, %v1017_v26, %v1018_v41  ;;  %v1021_v0 = vsel %vm991_vm3, %v1018_v41, %v1020_v19  ;;  %v1035_v40 = vrot.slane %v2440_v16, 2  ;;  %v1807_v19 = vld [vmem:[%s2794_s5 + $0x4] sm:$0x7] }
 0x10d   : > { %v850_v60 = vsel %vm779_vm2, %v781_v52, 0.0  ;;  %2059 = vrot.lane.b32.xlu0 %v2058_v50, %s2175_s8  ;;  %v2053_v2 = vpack.i.bf16 %v1026_v13, %v1024_v8  ;;  %v923_v4 = vsel %vm880_vm4, %v921_v58, %v922_v51  ;;  %v925_v7 = vsel %vm880_vm4, %v922_v51, %v924_v54  ;;  %1963 = vmatprep.subr.msk.bf16.mxu1 %vm1181_vm5, %v1807_v19 }
 0x10e   : > { %v918_v9 = vsel %vm880_vm4, %v916_v63, %v917_v34  ;;  %v920_v14 = vsel %vm880_vm4, %v917_v34, %v919_v57  ;;  %v1033_v17 = vrot.slane %v2462_v35, 2  ;;  %v1032_v26 = vrot.slane %v2451_v20, 2 }
 0x10f   : > { %v881_v18 = vrot.slane %v2505_v62, 1  ;;  %v2525_v16 = vsel %vm779_vm2, %v780_v27, %v781_v52  ;;  %2054 = vrot.lane.b32.xlu1 %v2053_v2, %s2174_s25  ;;  %v2063_v46 = vpack.i.bf16 %v1021_v0, %v1019_v37  ;;  %v992_v29 = vrot.slane %v2505_v62, 2 }
 0x110   : > { %v1027_v25 = vrot.slane %v2455_v28, 2  ;;  %v1030_v54 = vrot.slane %v2478_v39, 2  ;;  %v1028_v27 = vrot.slane %v2475_v38, 2  ;;  %v2544_v31 = vsel %vm779_vm2, %v807_v15, %v808_v12 }
 0x111   : > { %v995_v32 = vrot.slane %v850_v60, 2  ;;  %2064 = vrot.lane.b32.xlu0 %v2063_v46, %s2174_s25  ;;  %v2068_v33 = vpack.i.bf16 %v925_v7, %v923_v4  ;;  %v2073_v1 = vpack.i.bf16 %v920_v14, %v918_v9  ;;  %v1034_v5 = vsel %vm991_vm3, %v1032_v26, %v1033_v17 }
 0x112   : > { %v1036_v39 = vsel %vm991_vm3, %v1033_v17, %v1035_v40  ;;  %v993_v47 = vrot.slane %v2525_v16, 2  ;;  %v859_v41 = vsel %vm779_vm2, %v808_v12, 0.0  ;;  %v1183_v43 = vsel %vm1181_vm5, %v1807_v19, 0 }
 0x113   : > { %2069 = vrot.lane.b32.xlu1 %v2068_v33, %s2175_s8  ;;  %v1286_v15 = vsel %vm1181_vm5, %v1153_v21, 0  ;;  %v1391_v45 = vsel %vm1181_vm5, %v1824_v30, 0  ;;  %v884_v61 = vrot.slane %v850_v60, 1  ;;  %v1029_v48 = vsel %vm991_vm3, %v1027_v25, %v1028_v27  ;;  %1908 = vmatpush3.bf16.msra.mxu1 %v1183_v43 }
 0x114   : > { %v1031_v49 = vsel %vm991_vm3, %v1028_v27, %v1030_v54  ;;  %v882_v52 = vrot.slane %v2525_v16, 1  ;;  %v1037_v53 = vrot.slane %v2501_v22, 2  ;;  %v2083_v50 = vpack.i.bf16 %v1036_v39, %v1034_v5  ;;  %1926 = vmatpush3.bf16.msra.mxu0 %v1286_v15  ;;  %1965 = vmatprep.subr.msk.bf16.mxu1 %vm1181_vm5, %v1824_v30 }
 0x115   : > { %2074 = vrot.lane.b32.xlu0 %v2073_v1, %s2175_s8  ;;  %v1040_v51 = vrot.slane %v859_v41, 2  ;;  %v994_v57 = vsel %vm991_vm3, %v992_v29, %v993_v47  ;;  %v996_v8 = vsel %vm991_vm3, %v993_v47, %v995_v32  ;;  %v1038_v13 = vrot.slane %v2544_v31, 2 }
 0x116   : > { %v926_v34 = vrot.slane %v2501_v22, 1  ;;  %v2078_v58 = vpack.i.bf16 %v1031_v49, %v1029_v48  ;;  %v929_v63 = vrot.slane %v859_v41, 1  ;;  %v883_v12 = vsel %vm880_vm4, %v881_v18, %v882_v52 }
 0x117   : > { %2084 = vrot.lane.b32.xlu1 %v2083_v50, %s2174_s25  ;;  %v885_v37 = vsel %vm880_vm4, %v882_v52, %v884_v61  ;;  %v927_v0 = vrot.slane %v2544_v31, 1  ;;  %v2093_v40 = vpack.i.bf16 %v996_v8, %v994_v57  ;;  %v1039_v60 = vsel %vm991_vm3, %v1037_v53, %v1038_v13 }
 0x118   : > { %v1041_v2 = vsel %vm991_vm3, %v1038_v13, %v1040_v51  ;;  %v2088_v4 = vpack.i.bf16 %v885_v37, %v883_v12 }
 0x119   : > { %2079 = vrot.lane.b32.xlu0 %v2078_v58, %s2174_s25  ;;  %v928_v7 = vsel %vm880_vm4, %v926_v34, %v927_v0  ;;  %v930_v9 = vsel %vm880_vm4, %v927_v0, %v929_v63  ;;  %v2103_v14 = vpack.i.bf16 %v1041_v2, %v1039_v60 }
 0x11a   : > { %v2098_v17 = vpack.i.bf16 %v930_v9, %v928_v7 }
 0x11b   : > { %2094 = vrot.lane.b32.xlu1 %v2093_v40, %s2174_s25 }
 0x11d   : > { %2089 = vrot.lane.b32.xlu0 %v2088_v4, %s2175_s8 }
 0x11f   : > { %2104 = vrot.lane.b32.xlu1 %v2103_v14, %s2174_s25 }
 0x121   : > { %2099 = vrot.lane.b32.xlu0 %v2098_v17, %s2175_s8 }
 0x15f   : > { %v2020_v26 = vpop.permute.xlu1 %2019 }
 0x160   : > { %v2022_v18 = vunpack.i.h.bf16 %v2020_v26  ;;  %v2021_v46 = vunpack.i.l.bf16 %v2020_v26  ;;  %v2010_v19 = vpop.permute.xlu0 %2009 }
 0x161   : > { %v2012_v21 = vunpack.i.h.bf16 %v2010_v19  ;;  %v2011_v29 = vunpack.i.l.bf16 %v2010_v19 }
 0x163   : > { %v1106_v25 = vsel %vm1102_vm6, %v2316_v36, %v2012_v21  ;;  %v1105_v54 = vsel %vm1102_vm6, %v2321_v44, %v2011_v29 }
 0x164   : > { %v1125_v27 = vsel %vm512_vm1, %v1105_v54, %v2021_v46  ;;  %v1126_v30 = vsel %vm512_vm1, %v1106_v25, %v2022_v18 }
 0x165   : > { %v2586_v32 = vpack.c.bf16 %v1126_v30, %v1125_v27 }
 0x167   : > { %1909 = vmatprep.mubr.msk.bf16.mxu1 %vm1156_vm7, %v2586_v32  ;;  %v2025_v33 = vpop.permute.xlu1 %2024 }
 0x168   : > { %v2027_v1 = vunpack.i.h.bf16 %v2025_v33  ;;  %v2026_v5 = vunpack.i.l.bf16 %v2025_v33 }
 0x16b   : > { %v2015_v39 = vpop.permute.xlu0 %2014 }
 0x16c   : > { %v2017_v47 = vunpack.i.h.bf16 %v2015_v39  ;;  %v2016_v41 = vunpack.i.l.bf16 %v2015_v39 }
 0x16e   : > { %v1108_v36 = vsel %vm1102_vm6, %v2341_v11, %v2017_v47  ;;  %v1107_v44 = vsel %vm1102_vm6, %v2338_v6, %v2016_v41 }
 0x16f   : > { %v1128_v43 = vsel %vm512_vm1, %v1108_v36, %v2027_v1  ;;  %v1127_v15 = vsel %vm512_vm1, %v1107_v44, %v2026_v5 }
 0x170   : > { %v2596_v61 = vpack.c.bf16 %v1128_v43, %v1127_v15  ;;  %v2030_v48 = vpop.permute.xlu1 %2029 }
 0x171   : > { %v2032_v52 = vunpack.i.h.bf16 %v2030_v48  ;;  %v2031_v53 = vunpack.i.l.bf16 %v2030_v48 }
 0x172   : > { %1910 = vmatmul.mubr.msk.bf16.vlgmr.msra.gmra.mxu1 %vm1156_vm7, %v2596_v61 }
 0x173   : > { %1944 = vmatpush3.bf16.msra.mxu1 %v1391_v45  ;;  %v2040_v49 = vpop.permute.xlu0 %2039  ;;  %v1112_v6 = vsel %vm1102_vm6, %v2370_v42, %v2032_v52  ;;  %v1111_v13 = vsel %vm1102_vm6, %v2350_v23, %v2031_v53 }
 0x174   : > { %v2042_v50 = vunpack.i.h.bf16 %v2040_v49  ;;  %v2041_v51 = vunpack.i.l.bf16 %v2040_v49 }
 0x176   : > { %v1110_v37 = vsel %vm1102_vm6, %v2388_v59, %v2042_v50  ;;  %v1109_v0 = vsel %vm1102_vm6, %v2353_v24, %v2041_v51 }
 0x179   : > { %v2035_v11 = vpop.permute.xlu1 %2034 }
 0x17a   : > { %v2037_v57 = vunpack.i.h.bf16 %v2035_v11  ;;  %v2036_v8 = vunpack.i.l.bf16 %v2035_v11 }
 0x17b   : > { %v2045_v34 = vpop.permute.xlu0 %2044 }
 0x17c   : > { %v1131_v58 = vsel %vm512_vm1, %v1111_v13, %v2036_v8  ;;  %v1132_v63 = vsel %vm512_vm1, %v1112_v6, %v2037_v57  ;;  %v2047_v45 = vunpack.i.h.bf16 %v2045_v34  ;;  %v2046_v12 = vunpack.i.l.bf16 %v2045_v34 }
 0x17d   : > { %v2050_v40 = vpop.permute.xlu1 %2049  ;;  %v2610_v60 = vpack.c.bf16 %v1132_v63, %v1131_v58 }
 0x17e   : > { %v1129_v42 = vsel %vm512_vm1, %v1109_v0, %v2046_v12  ;;  %v1130_v23 = vsel %vm512_vm1, %v1110_v37, %v2047_v45  ;;  %v2052_v4 = vunpack.i.h.bf16 %v2050_v40  ;;  %v2051_v7 = vunpack.i.l.bf16 %v2050_v40 }
 0x17f   : > { %v2614_v2 = vpack.c.bf16 %v1130_v23, %v1129_v42  ;;  %v2060_v9 = vpop.permute.xlu0 %2059 }
 0x180   : > { %v2062_v14 = vunpack.i.h.bf16 %v2060_v9  ;;  %v2061_v17 = vunpack.i.l.bf16 %v2060_v9  ;;  %v1116_v18 = vsel %vm1102_vm6, %v2416_v56, %v2052_v4  ;;  %v1115_v46 = vsel %vm1102_vm6, %v2385_v55, %v2051_v7 }
 0x181   : > { %1913 = vmatprep.mubr.msk.bf16.mxu1 %vm1156_vm7, %v2614_v2  ;;  %v2055_v59 = vpop.permute.xlu1 %2054 }
 0x182   : > { %1914 = vmatmul.mubr.msk.bf16.gmra.mxu1 %vm1156_vm7, %v2610_v60  ;;  %v2057_v24 = vunpack.i.h.bf16 %v2055_v59  ;;  %v2056_v26 = vunpack.i.l.bf16 %v2055_v59  ;;  %v1114_v27 = vsel %vm1102_vm6, %v2434_v10, %v2062_v14  ;;  %v1113_v30 = vsel %vm1102_vm6, %v2400_v3, %v2061_v17 }
 0x183   : > { %v2065_v19 = vpop.permute.xlu0 %2064 }
 0x184   : > { %v1135_v21 = vsel %vm512_vm1, %v1115_v46, %v2056_v26  ;;  %v1136_v29 = vsel %vm512_vm1, %v1116_v18, %v2057_v24  ;;  %v2067_v25 = vunpack.i.h.bf16 %v2065_v19  ;;  %v2066_v54 = vunpack.i.l.bf16 %v2065_v19 }
 0x185   : > { %v2070_v33 = vpop.permute.xlu1 %2069  ;;  %v1149_v1 = vpack.c.bf16 %v1136_v29, %v1135_v21 }
 0x186   : > { %v1133_v56 = vsel %vm512_vm1, %v1113_v30, %v2066_v54  ;;  %v1134_v5 = vsel %vm512_vm1, %v1114_v27, %v2067_v25  ;;  %v2072_v39 = vunpack.i.h.bf16 %v2070_v33  ;;  %v2071_v47 = vunpack.i.l.bf16 %v2070_v33 }
 0x187   : > { %v1148_v55 = vpack.c.bf16 %v1134_v5, %v1133_v56  ;;  %v2075_v41 = vpop.permute.xlu0 %2074 }
 0x188   : > { %v2077_v36 = vunpack.i.h.bf16 %v2075_v41  ;;  %v2076_v44 = vunpack.i.l.bf16 %v2075_v41  ;;  %v1120_v3 = vsel %vm1102_vm6, %v2462_v35, %v2072_v39  ;;  %v1119_v48 = vsel %vm1102_vm6, %v2451_v20, %v2071_v47  ;;  %v2702_v39 = vld [vmem:[%s2795_s6] ss:$0 sm:$0xff] }
 0x189   : > { %1917 = vmatprep.mubr.msk.bf16.mxu1 %vm1156_vm7, %v1148_v55  ;;  %v2085_v43 = vpop.permute.xlu1 %2084 }
 0x18a   : > { %1918 = vmatmul.mubr.msk.bf16.gmra.mxu1 %vm1156_vm7, %v1149_v1  ;;  %v2087_v10 = vunpack.i.h.bf16 %v2085_v43  ;;  %v2086_v15 = vunpack.i.l.bf16 %v2085_v43  ;;  %v1118_v11 = vsel %vm1102_vm6, %v2475_v38, %v2077_v36  ;;  %v1117_v57 = vsel %vm1102_vm6, %v2455_v28, %v2076_v44 }
 0x18b   : > { %v2080_v49 = vpop.permute.xlu0 %2079 }
 0x18c   : > { %v1139_v52 = vsel %vm512_vm1, %v1119_v48, %v2086_v15  ;;  %v1140_v53 = vsel %vm512_vm1, %v1120_v3, %v2087_v10  ;;  %v2082_v50 = vunpack.i.h.bf16 %v2080_v49  ;;  %v2081_v51 = vunpack.i.l.bf16 %v2080_v49 }
 0x18d   : > { %v2095_v8 = vpop.permute.xlu1 %2094  ;;  %v1151_v6 = vpack.c.bf16 %v1140_v53, %v1139_v52  ;;  %v2126_v52 = vld [vmem:[%s2261_s20 + $0x8] sm:$0xff]  }
 0x18e   : > { %v1137_v35 = vsel %vm512_vm1, %v1117_v57, %v2081_v51  ;;  %v1138_v13 = vsel %vm512_vm1, %v1118_v11, %v2082_v50  ;;  %v2097_v34 = vunpack.i.h.bf16 %v2095_v8  ;;  %v2096_v58 = vunpack.i.l.bf16 %v2095_v8  ;;  %v2127_v57 = vld [vmem:[%s2261_s20] sm:$0xff]  }
 0x18f   : > { %v1150_v20 = vpack.c.bf16 %v1138_v13, %v1137_v35  ;;  %v2090_v63 = vpop.permute.xlu0 %2089  ;;  %v1563_v53 = vunpack.c.l.bf16 %v2126_v52  ;;  %v1561_v8 = vunpack.c.l.bf16 %v2127_v57 }
 0x190   : > { %v2092_v45 = vunpack.i.h.bf16 %v2090_v63  ;;  %v2091_v12 = vunpack.i.l.bf16 %v2090_v63 }
 0x191   : > { %1921 = vmatprep.mubr.msk.bf16.mxu1 %vm1156_vm7, %v1150_v20 }
 0x192   : > { %v1104_v38 = vsel %vm1102_vm6, %v2525_v16, %v2092_v45  ;;  %v1103_v28 = vsel %vm1102_vm6, %v2505_v62, %v2091_v12  ;;  %1922 = vmatmul.mubr.msk.bf16.gmra.mxu1 %vm1156_vm7, %v1151_v6  ;;  %v2105_v16 = vpop.permute.xlu1 %2104  ;;  %v1564_v45 = vunpack.c.h.bf16 %v2126_v52 }
 0x193   : > { %1945 = vmatprep.mubr.msk.bf16.mxu1 %vm1156_vm7, %v2596_v61  ;;  %v1123_v37 = vsel %vm512_vm1, %v1103_v28, %v2096_v58  ;;  %v1124_v0 = vsel %vm512_vm1, %v1104_v38, %v2097_v34  ;;  %v2100_v62 = vpop.permute.xlu0 %2099  ;;  %v2107_v42 = vunpack.i.h.bf16 %v2105_v16  ;;  %v2106_v23 = vunpack.i.l.bf16 %v2105_v16 }
 0x194   : > { %v1143_v40 = vpack.c.bf16 %v1124_v0, %v1123_v37  ;;  %v1562_v16 = vunpack.c.h.bf16 %v2127_v57 }
 0x196   : > { %1927 = vmatprep.mubr.msk.bf16.mxu0 %vm1156_vm7, %v1143_v40 }
 0x197   : > { %1928 = vmatmul.mubr.msk.bf16.vlgmr.msra.gmra.mxu0 %vm1156_vm7, %v2586_v32  ;;  %v2102_v32 = vunpack.i.h.bf16 %v2100_v62 }
 0x198   : > { %1931 = vmatprep.mubr.msk.bf16.mxu0 %vm1156_vm7, %v2596_v61  ;;  %v2101_v61 = vunpack.i.l.bf16 %v2100_v62 }
 0x19a   : > { %1946 = vmatmul.mubr.msk.bf16.vlgmr.msra.gmra.mxu1 %vm1156_vm7, %v2614_v2 }
 0x19b   : > { %1949 = vmatprep.mubr.msk.bf16.mxu1 %vm1156_vm7, %v2610_v60 }
 0x19f   : > { %1932 = vmatmul.mubr.msk.bf16.gmra.mxu0 %vm1156_vm7, %v2614_v2  ;;  %v1122_v2 = vsel %vm1102_vm6, %v2544_v31, %v2102_v32 }
 0x1a0   : > { %1935 = vmatprep.mubr.msk.bf16.mxu0 %vm1156_vm7, %v2610_v60  ;;  %v1121_v60 = vsel %vm1102_vm6, %v2501_v22, %v2101_v61  ;;  %v1142_v4 = vsel %vm512_vm1, %v1122_v2, %v2107_v42 }
 0x1a1   : > { %v1141_v7 = vsel %vm512_vm1, %v1121_v60, %v2106_v23 }
 0x1a2   : > { %1950 = vmatmul.mubr.msk.bf16.gmra.mxu1 %vm1156_vm7, %v1148_v55  ;;  %v1152_v9 = vpack.c.bf16 %v1142_v4, %v1141_v7 }
 0x1a3   : > { %1953 = vmatprep.mubr.msk.bf16.mxu1 %vm1156_vm7, %v1149_v1 }
 0x1a7   : > { %1936 = vmatmul.mubr.msk.bf16.gmra.mxu0 %vm1156_vm7, %v1148_v55 }
 0x1a8   : > { %1939 = vmatprep.mubr.msk.bf16.mxu0 %vm1156_vm7, %v1149_v1 }
 0x1aa   : > { %1954 = vmatmul.mubr.msk.bf16.gmra.mxu1 %vm1156_vm7, %v1150_v20 }
 0x1ab   : > { %1957 = vmatprep.mubr.msk.bf16.mxu1 %vm1156_vm7, %v1151_v6 }
 0x1af   : > { %1940 = vmatmul.mubr.msk.bf16.gmra.mxu0 %vm1156_vm7, %v1150_v20 }
 0x1b2   : > { %1958 = vmatmul.mubr.msk.bf16.gmra.mxu1 %vm1156_vm7, %v1152_v9 }
 0x232   : > { %v1911_v14 = vpop.f32.mrf.mxu1 }
 0x234   : > { %v1219_v17 = vpop.f32.mrf.mxu1 }
 0x236   : > { %v1912_v59 = vpop.f32.mrf.mxu1 }
 0x238   : > { %v1222_v31 = vpop.f32.mrf.mxu1 }
 0x242   : > { %v1915_v24 = vpop.f32.mrf.mxu1 }
 0x244   : > { %v1235_v26 = vpop.f32.mrf.mxu1 }
 0x246   : > { %v1916_v22 = vpop.f32.mrf.mxu1 }
 0x248   : > { %v1238_v18 = vpop.f32.mrf.mxu1 }
 0x24a   : > { %v2683_v46 = vpop.f32.mrf.mxu1 }
 0x24c   : > { %v2685_v19 = vpop.f32.mrf.mxu1 }
 0x24e   : > { %v2687_v21 = vpop.f32.mrf.mxu1 }
 0x250   : > { %v2689_v29 = vpop.f32.mrf.mxu1 }
 0x252   : > { %v2691_v25 = vpop.f32.mrf.mxu1 }
 0x254   : > { %v2693_v54 = vpop.f32.mrf.mxu1 }
 0x256   : > { %v2695_v27 = vpop.f32.mrf.mxu1 }
 0x257   : > { %v1929_v30 = vpop.f32.mrf.mxu0 }
 0x258   : > { %v1331_v33 = vadd.f32 %v1929_v30, %v1911_v14  ;;  %v2697_v1 = vpop.f32.mrf.mxu1 }
 0x259   : > { %v1322_v56 = vpop.f32.mrf.mxu0 }
 0x25a   : > { %v1323_v5 = vadd.f32 %v1322_v56, %v1219_v17  ;;  %v1947_v55 = vpop.f32.mrf.mxu1 }
 0x25b   : > { %v1492_v47 = vadd.f32 %v1947_v55, %v1331_v33  ;;  %v1930_v41 = vpop.f32.mrf.mxu0  ;;  %v2128_v33 = vld [vmem:[%s2261_s20 + $0x18] sm:$0xff]  }
 0x25c   : > { %v1334_v36 = vadd.f32 %v1930_v41, %v1912_v59  ;;  %v1427_v44 = vpop.f32.mrf.mxu1  ;;  %v1567_v56 = vunpack.c.l.bf16 %v2128_v33 }
 0x25d   : > { %v1515_v43 = vadd.f32 %v2702_v39, %v1492_v47  ;;  %v1490_v10 = vadd.f32 %v1427_v44, %v1323_v5  ;;  %v1325_v15 = vpop.f32.mrf.mxu0  ;;  %v2129_v5 = vld [vmem:[%s2261_s20 + $0x10] sm:$0xff]  }
 0x25e   : > { %v1326_v3 = vadd.f32 %v1325_v15, %v1222_v31  ;;  %v1948_v48 = vpop.f32.mrf.mxu1  ;;  %v1565_v55 = vunpack.c.l.bf16 %v2129_v5  ;;  %v1566_v57 = vunpack.c.h.bf16 %v2129_v5 }
 0x25f   : > { %v1531_v49 = vmul.f32 0.1, %v1515_v43  ;;  %v1513_v50 = vadd.f32 %v2702_v39, %v1490_v10  ;;  %v1493_v51 = vadd.f32 %v1948_v48, %v1334_v36  ;;  %v1933_v11 = vpop.f32.mrf.mxu0 }
 0x260   : > { %v1347_v6 = vadd.f32 %v1933_v11, %v1915_v24  ;;  %v1430_v35 = vpop.f32.mrf.mxu1 }
 0x261   : > { %v1547_v13 = vmax.f32 %v1515_v43, %v1531_v49  ;;  %v1529_v20 = vmul.f32 0.1, %v1513_v50  ;;  %v1516_v34 = vadd.f32 %v2702_v39, %v1493_v51  ;;  %v1491_v58 = vadd.f32 %v1430_v35, %v1326_v3  ;;  %v1338_v63 = vpop.f32.mrf.mxu0 }
 0x262   : > { %v1339_v12 = vadd.f32 %v1338_v63, %v1235_v26  ;;  %v1951_v38 = vpop.f32.mrf.mxu1  ;;  %v1568_v3 = vunpack.c.h.bf16 %v2128_v33 }
 0x263   : > { %v1579_v28 = vadd.f32 %v1563_v53, %v1547_v13  ;;  %v1545_v37 = vmax.f32 %v1513_v50, %v1529_v20  ;;  %v1532_v0 = vmul.f32 0.1, %v1516_v34  ;;  %v1514_v40 = vadd.f32 %v2702_v39, %v1491_v58  ;;  %v1934_v62 = vpop.f32.mrf.mxu0  ;;  %v2130_v58 = vld [vmem:[%s2261_s20 + $0x28] sm:$0xff]  }
 0x264   : > { %v1496_v32 = vadd.f32 %v1951_v38, %v1347_v6  ;;  %v1350_v61 = vadd.f32 %v1934_v62, %v1916_v22  ;;  %v1443_v42 = vpop.f32.mrf.mxu1  ;;  %v1571_v63 = vunpack.c.l.bf16 %v2130_v58 }
 0x265   : > { %1595 = vst.msk [vmem:[%s2713_s15 + $0x10] sm:$0xff] %vm512_vm1, %v1579_v28  ;;  %v1577_v23 = vadd.f32 %v1561_v8, %v1545_v37  ;;  %v1548_v2 = vmax.f32 %v1516_v34, %v1532_v0  ;;  %v1530_v60 = vmul.f32 0.1, %v1514_v40  ;;  %v1494_v4 = vadd.f32 %v1443_v42, %v1339_v12  ;;  %v1341_v7 = vpop.f32.mrf.mxu0 }
 0x266   : > { %v1519_v9 = vadd.f32 %v2702_v39, %v1496_v32  ;;  %v1342_v14 = vadd.f32 %v1341_v7, %v1238_v18  ;;  %v1952_v17 = vpop.f32.mrf.mxu1 }
 0x267   : > { %1593 = vst.msk [vmem:[%s2713_s15] sm:$0xff] %vm512_vm1, %v1577_v23  ;;  %v1580_v59 = vadd.f32 %v1564_v45, %v1548_v2  ;;  %v1546_v31 = vmax.f32 %v1514_v40, %v1530_v60  ;;  %v1517_v24 = vadd.f32 %v2702_v39, %v1494_v4  ;;  %v1497_v26 = vadd.f32 %v1952_v17, %v1350_v61  ;;  %v1937_v22 = vpop.f32.mrf.mxu0  ;;  %v2131_v4 = vld [vmem:[%s2261_s20 + $0x20] sm:$0xff]  }
 0x268   : > { %v1535_v30 = vmul.f32 0.1, %v1519_v9  ;;  %v1363_v47 = vadd.f32 %v1937_v22, %v2683_v46  ;;  %v1446_v41 = vpop.f32.mrf.mxu1  ;;  %v1569_v7 = vunpack.c.l.bf16 %v2131_v4 }
 0x269   : > { %1596 = vst.msk [vmem:[%s2713_s15 + $0x18] sm:$0xff] %vm512_vm1, %v1580_v59  ;;  %v1578_v18 = vadd.f32 %v1562_v16, %v1546_v31  ;;  %v1533_v36 = vmul.f32 0.1, %v1517_v24  ;;  %v1520_v44 = vadd.f32 %v2702_v39, %v1497_v26  ;;  %v1495_v43 = vadd.f32 %v1446_v41, %v1342_v14  ;;  %v1354_v10 = vpop.f32.mrf.mxu0 }
 0x26a   : > { %v1551_v15 = vmax.f32 %v1519_v9, %v1535_v30  ;;  %v1355_v48 = vadd.f32 %v1354_v10, %v2685_v19  ;;  %v1955_v49 = vpop.f32.mrf.mxu1  ;;  %v1572_v9 = vunpack.c.h.bf16 %v2130_v58  ;;  %v1570_v30 = vunpack.c.h.bf16 %v2131_v4 }
 0x26b   : > { %1594 = vst.msk [vmem:[%s2713_s15 + $0x8] sm:$0xff] %vm512_vm1, %v1578_v18  ;;  %v1549_v52 = vmax.f32 %v1517_v24, %v1533_v36  ;;  %v1536_v46 = vmul.f32 0.1, %v1520_v44  ;;  %v1518_v53 = vadd.f32 %v2702_v39, %v1495_v43  ;;  %v1500_v50 = vadd.f32 %v1955_v49, %v1363_v47  ;;  %v1938_v51 = vpop.f32.mrf.mxu0  ;;  %v2132_v36 = vld [vmem:[%s2261_s20 + $0x38] sm:$0xff]   ;;  %v2133_v49 = vld [vmem:[%s2261_s20 + $0x30] sm:$0xff]  }
 0x26c   : > { %v1583_v11 = vadd.f32 %v1567_v56, %v1551_v15  ;;  %v1366_v8 = vadd.f32 %v1938_v51, %v2687_v21  ;;  %v1459_v6 = vpop.f32.mrf.mxu1  ;;  %v1574_v58 = vunpack.c.h.bf16 %v2133_v49 }
 0x26d   : > { %v1581_v35 = vadd.f32 %v1565_v55, %v1549_v52  ;;  %v1552_v13 = vmax.f32 %v1520_v44, %v1536_v46  ;;  %v1534_v19 = vmul.f32 0.1, %v1518_v53  ;;  %v1523_v20 = vadd.f32 %v2702_v39, %v1500_v50  ;;  %v1357_v34 = vpop.f32.mrf.mxu0 }
 0x26e   : > { %1599 = vst.msk [vmem:[%s2713_s15 + $0x30] sm:$0xff] %vm512_vm1, %v1583_v11  ;;  %v1498_v45 = vadd.f32 %v1459_v6, %v1355_v48  ;;  %v1358_v12 = vadd.f32 %v1357_v34, %v2689_v29  ;;  %v1956_v38 = vpop.f32.mrf.mxu1  ;;  %v1575_v44 = vunpack.c.l.bf16 %v2132_v36  ;;  %v1573_v52 = vunpack.c.l.bf16 %v2133_v49 }
 0x26f   : > { %1597 = vst.msk [vmem:[%s2713_s15 + $0x20] sm:$0xff] %vm512_vm1, %v1581_v35  ;;  %v1584_v21 = vadd.f32 %v1568_v3, %v1552_v13  ;;  %v1550_v28 = vmax.f32 %v1518_v53, %v1534_v19  ;;  %v1539_v37 = vmul.f32 0.1, %v1523_v20  ;;  %v1501_v0 = vadd.f32 %v1956_v38, %v1366_v8  ;;  %v1941_v40 = vpop.f32.mrf.mxu0 }
 0x270   : > { %v1521_v62 = vadd.f32 %v2702_v39, %v1498_v45  ;;  %v1379_v16 = vadd.f32 %v1941_v40, %v2691_v25  ;;  %v1462_v32 = vpop.f32.mrf.mxu1  ;;  %v1576_v19 = vunpack.c.h.bf16 %v2132_v36 }
 0x271   : > { %1600 = vst.msk [vmem:[%s2713_s15 + $0x38] sm:$0xff] %vm512_vm1, %v1584_v21  ;;  %v1582_v61 = vadd.f32 %v1566_v57, %v1550_v28  ;;  %v1555_v42 = vmax.f32 %v1523_v20, %v1539_v37  ;;  %v1524_v29 = vadd.f32 %v2702_v39, %v1501_v0  ;;  %v1499_v23 = vadd.f32 %v1462_v32, %v1358_v12  ;;  %v1370_v2 = vpop.f32.mrf.mxu0 }
 0x272   : > { %v1537_v60 = vmul.f32 0.1, %v1521_v62  ;;  %v1371_v14 = vadd.f32 %v1370_v2, %v2693_v54  ;;  %v1959_v17 = vpop.f32.mrf.mxu1 }
 0x273   : > { %1598 = vst.msk [vmem:[%s2713_s15 + $0x28] sm:$0xff] %vm512_vm1, %v1582_v61  ;;  %v1587_v25 = vadd.f32 %v1571_v63, %v1555_v42  ;;  %v1540_v59 = vmul.f32 0.1, %v1524_v29  ;;  %v1522_v31 = vadd.f32 %v2702_v39, %v1499_v23  ;;  %v1504_v24 = vadd.f32 %v1959_v17, %v1379_v16  ;;  %v1942_v26 = vpop.f32.mrf.mxu0 }
 0x274   : > { %v1553_v22 = vmax.f32 %v1521_v62, %v1537_v60  ;;  %v1382_v33 = vadd.f32 %v1942_v26, %v2695_v27  ;;  %v1475_v56 = vpop.f32.mrf.mxu1 }
 0x275   : > { %1603 = vst.msk [vmem:[%s2713_s15 + $0x50] sm:$0xff] %vm512_vm1, %v1587_v25  ;;  %v1556_v54 = vmax.f32 %v1524_v29, %v1540_v59  ;;  %v1538_v5 = vmul.f32 0.1, %v1522_v31  ;;  %v1527_v55 = vadd.f32 %v2702_v39, %v1504_v24  ;;  %v1502_v47 = vadd.f32 %v1475_v56, %v1371_v14  ;;  %v1373_v41 = vpop.f32.mrf.mxu0 }
 0x276   : > { %v1585_v18 = vadd.f32 %v1569_v7, %v1553_v22  ;;  %v1374_v43 = vadd.f32 %v1373_v41, %v2697_v1  ;;  %v1960_v10 = vpop.f32.mrf.mxu1 }
 0x277   : > { %v1588_v27 = vadd.f32 %v1572_v9, %v1556_v54  ;;  %v1554_v15 = vmax.f32 %v1522_v31, %v1538_v5  ;;  %v1543_v3 = vmul.f32 0.1, %v1527_v55  ;;  %v1525_v48 = vadd.f32 %v2702_v39, %v1502_v47 }
 0x278   : > { %1601 = vst.msk [vmem:[%s2713_s15 + $0x40] sm:$0xff] %vm512_vm1, %v1585_v18  ;;  %v1505_v46 = vadd.f32 %v1960_v10, %v1382_v33  ;;  %v1478_v53 = vpop.f32.mrf.mxu1 }
 0x279   : > { %1604 = vst.msk [vmem:[%s2713_s15 + $0x58] sm:$0xff] %vm512_vm1, %v1588_v27  ;;  %v1586_v50 = vadd.f32 %v1570_v30, %v1554_v15  ;;  %v1559_v51 = vmax.f32 %v1527_v55, %v1543_v3  ;;  %v1541_v1 = vmul.f32 0.1, %v1525_v48  ;;  %v1503_v11 = vadd.f32 %v1478_v53, %v1374_v43 }
 0x27a   : > { %v1528_v57 = vadd.f32 %v2702_v39, %v1505_v46 }
 0x27b   : > { %1602 = vst.msk [vmem:[%s2713_s15 + $0x48] sm:$0xff] %vm512_vm1, %v1586_v50  ;;  %v1591_v8 = vadd.f32 %v1575_v44, %v1559_v51  ;;  %v1557_v6 = vmax.f32 %v1525_v48, %v1541_v1  ;;  %v1526_v35 = vadd.f32 %v2702_v39, %v1503_v11 }
 0x27c   : > { %v1544_v13 = vmul.f32 0.1, %v1528_v57 }
 0x27d   : > { %1607 = vst.msk [vmem:[%s2713_s15 + $0x70] sm:$0xff] %vm512_vm1, %v1591_v8  ;;  %v1589_v20 = vadd.f32 %v1573_v52, %v1557_v6  ;;  %v1542_v34 = vmul.f32 0.1, %v1526_v35 }
 0x27e   : > { %v1560_v63 = vmax.f32 %v1528_v57, %v1544_v13 }
 0x27f   : > { %1605 = vst.msk [vmem:[%s2713_s15 + $0x60] sm:$0xff] %vm512_vm1, %v1589_v20  ;;  %v1558_v45 = vmax.f32 %v1526_v35, %v1542_v34 }
 0x280   : > { %v1592_v12 = vadd.f32 %v1576_v19, %v1560_v63 }
 0x281   : > { %v1590_v38 = vadd.f32 %v1574_v58, %v1558_v45 }
 0x282   : > { %1608 = vst.msk [vmem:[%s2713_s15 + $0x78] sm:$0xff] %vm512_vm1, %v1592_v12 }
 0x283   : > { %1606 = vst.msk [vmem:[%s2713_s15 + $0x68] sm:$0xff] %vm512_vm1, %v1590_v38 }
 0x284 PF: > { %s17_s28 = sadd.s32 1, %s2172_s28   ;;  %s2798_s24 = smov %s2164_s26 }
 0x285   : > { %p14_p12 = scmp.ge.s32.totalorder %s17_s28, 6   ;;  %s2799_s25 = smov %s2168_s27 }
 0x286   : > { %s2800_s26 = smov %s2803_s29  ;;  %s2801_s27 = smov %s2807_s30 }
 0x287   :  { %16 = sbr.rel (!%p14_p12) target bundleno = 3 (0x3), region = 86 }

</bundles_post_ra>
